<compile_context>
chip_gen: v7x
topology: tpu7x:2x2x1
jax: 0.10.0
libtpu: 0.0.40
codegen_flags: <defaults>
</compile_context>

<pallas_src>
import jax
import jax.numpy as jnp
from jax.experimental import pallas as pl
from jax.experimental.pallas import tpu as pltpu

LOG_STD_MAX = 0.0
LOG_STD_MIN = -3.0


def _leaky_relu(x, slope=0.01):
    # slope < 1  =>  max(x, slope*x) == leaky_relu(x); cheaper than where().
    return jnp.maximum(x, slope * x)


def policy_sac_kernel(x_ref,
                      w1_ref, b1_ref,
                      w2_ref, b2_ref,
                      w3_ref, b3_ref,
                      w4_ref, b4_ref,
                      wh_ref, bh_ref,
                      scale_ref, off_ref,
                      out_ref):
    def lin(h, w_ref, b_ref):
        # bf16 MXU inputs, f32 accumulation, f32 bias add.
        return jnp.dot(h.astype(w_ref.dtype), w_ref[...],
                       preferred_element_type=jnp.float32) + b_ref[...]

    h = x_ref[...]                                   # f32 (TM, in)
    h = _leaky_relu(lin(h, w1_ref, b1_ref))          # (TM, 512)
    h = _leaky_relu(lin(h, w2_ref, b2_ref))          # (TM, 256)
    h = _leaky_relu(lin(h, w3_ref, b3_ref))          # (TM, 128)
    h = _leaky_relu(lin(h, w4_ref, b4_ref))          # (TM, 64)

    # Fused mean|logstd head: single matmul + single tanh (EUP) + affine (VPU).
    t = jnp.tanh(lin(h, wh_ref, bh_ref))             # (TM, 2*out_c) f32
    # Columns [0, C): scale=1, off=0 (mean).  Columns [C, 2C): log_std affine.
    out_ref[...] = t * scale_ref[...] + off_ref[...]


def policy_sac_forward(x, params, *, tile_m=256):
    """x: (B, input_shape) f32.  Returns (mean, log_std), each (B, out_c) f32."""
    B, in_dim = x.shape
    out2 = params["wh"].shape[1]          # 2 * out_c
    out_c = out2 // 2

    # Batch tiling: TM = B for small batches (full-array block), else a
    # tile_m-aligned tile.  Resident bf16 weights are ~0.4 MB so even on
    # v7x's 64 MiB VMEM the double-buffered activation tiles fit easily.
    TM = B if B <= tile_m else tile_m
    grid_m = pl.cdiv(B, TM)
    Bp = grid_m * TM
    if Bp != B:
        x = jnp.pad(x, ((0, Bp - B), (0, 0)))

    weight_args = (
        params["w1"], params["b1"],
        params["w2"], params["b2"],
        params["w3"], params["b3"],
        params["w4"], params["b4"],
        params["wh"], params["bh"],
        params["scale"], params["offset"],
    )

    x_spec = pl.BlockSpec((TM, in_dim), lambda i: (i, 0))
    # Full-array blocks with constant index_map: DMA'd once, VMEM-resident.
    w_specs = [pl.BlockSpec(w.shape, lambda i: (0, 0)) for w in weight_args]
    out_spec = pl.BlockSpec((TM, out2), lambda i: (i, 0))

    out = pl.pallas_call(
        policy_sac_kernel,
        out_shape=jax.ShapeDtypeStruct((Bp, out2), jnp.float32),
        grid=(grid_m,),
        in_specs=[x_spec] + w_specs,
        out_specs=out_spec,
        compiler_params=pltpu.CompilerParams(
            dimension_semantics=("parallel",)),
    )(x, *weight_args)

    out = out[:B]
    mean = out[:, :out_c]
    log_std = out[:, out_c:]
    return mean, log_std


def _xavier_uniform(key, fan_out, fan_in, gain=1.0):
    # Matches torch.nn.init.xavier_uniform_ on a (fan_out, fan_in) weight.
    bound = gain * jnp.sqrt(6.0 / (fan_in + fan_out))
    return jax.random.uniform(key, (fan_out, fan_in), jnp.float32, -bound, bound)


def init_params(key, input_shape, out_c):
    """Build pre-transposed, bf16 weights; fused head; f32 biases/affine vecs."""
    dims = [(input_shape, 512), (512, 256), (256, 128), (128, 64),
            (64, out_c), (64, out_c)]
    names = ["1", "2", "3", "4", "m", "s"]
    raw = {}
    keys = jax.random.split(key, len(dims))
    for k, (fin, fout), n in zip(keys, dims, names):
        w_torch = _xavier_uniform(k, fout, fin)            # torch layout (out, in)
        raw["w" + n] = jnp.transpose(w_torch)              # kernel layout (in, out)
        raw["b" + n] = jnp.zeros((1, fout), jnp.float32)

    params = {}
    for n in ["1", "2", "3", "4"]:
        params["w" + n] = raw["w" + n].astype(jnp.bfloat16)
        params["b" + n] = raw["b" + n]                     # f32

    # Fused head: [mean | logstd] along the output (lane) axis.
    params["wh"] = jnp.concatenate([raw["wm"], raw["ws"]], axis=1).astype(jnp.bfloat16)
    params["bh"] = jnp.concatenate([raw["bm"], raw["bs"]], axis=1)   # f32 (1, 2C)

    # Per-column affine applied after tanh:
    #   mean cols:    1.0 * t + 0.0
    #   logstd cols:  0.5*(MAX-MIN) * t + (MIN + 0.5*(MAX-MIN))
    s = 0.5 * (LOG_STD_MAX - LOG_STD_MIN)
    params["scale"] = jnp.concatenate(
        [jnp.ones((1, out_c), jnp.float32), jnp.full((1, out_c), s, jnp.float32)], axis=1)
    params["offset"] = jnp.concatenate(
        [jnp.zeros((1, out_c), jnp.float32),
         jnp.full((1, out_c), LOG_STD_MIN + s, jnp.float32)], axis=1)
    return params


def _reference_forward(x, params):
    """Pure-JAX reference using the same bf16 weights / f32 accumulation."""
    def lin(h, w, b):
        return jnp.dot(h.astype(w.dtype), w, preferred_element_type=jnp.float32) + b

    out_c = params["wh"].shape[1] // 2
    h = x
    for n in ["1", "2", "3", "4"]:
        h = _leaky_relu(lin(h, params["w" + n], params["b" + n]))
    wm, ws = params["wh"][:, :out_c], params["wh"][:, out_c:]
    bm, bs = params["bh"][:, :out_c], params["bh"][:, out_c:]
    mean = jnp.tanh(lin(h, wm, bm))
    t = jnp.tanh(lin(h, ws, bs))
    log_std = LOG_STD_MIN + 0.5 * (LOG_STD_MAX - LOG_STD_MIN) * (t + 1.0)
    return mean, log_std


if __name__ == "__main__":
    key = jax.random.PRNGKey(0)
    k_param, k_x1, k_x2 = jax.random.split(key, 3)

    input_shape = 32
    out_c = 4
    params = init_params(k_param, input_shape, out_c)

    # Small batch (single-shot, full-array block).
    batch = 2
    x = jax.random.normal(k_x1, (batch, input_shape), jnp.float32)
    mean, log_std = policy_sac_forward(x, params)
    jax.block_until_ready((mean, log_std))

    ref_mean, ref_log_std = _reference_forward(x, params)
    assert mean.shape == (batch, out_c) and log_std.shape == (batch, out_c)
    assert jnp.allclose(mean, ref_mean, atol=1e-3, rtol=1e-3)
    assert jnp.allclose(log_std, ref_log_std, atol=1e-3, rtol=1e-3)
    assert bool(jnp.all(log_std >= LOG_STD_MIN - 1e-3))
    assert bool(jnp.all(log_std <= LOG_STD_MAX + 1e-3))

    # Larger, non-multiple-of-tile batch to exercise the batch grid + padding.
    big_batch = 600
    xb = jax.random.normal(k_x2, (big_batch, input_shape), jnp.float32)
    mean_b, log_std_b = policy_sac_forward(xb, params, tile_m=256)
    jax.block_until_ready((mean_b, log_std_b))
    ref_mean_b, ref_log_std_b = _reference_forward(xb, params)
    assert mean_b.shape == (big_batch, out_c)
    assert jnp.allclose(mean_b, ref_mean_b, atol=1e-3, rtol=1e-3)
    assert jnp.allclose(log_std_b, ref_log_std_b, atol=1e-3, rtol=1e-3)

    print("KERNEL_OK")
</pallas_src>

<mosaic_0001>
module attributes {stable_mosaic.version = 11 : i64} {
  func.func @policy_sac_kernel(%arg0: i32, %arg1: memref<2x32xf32, #tpu.memory_space<vmem>>, %arg2: memref<32x512xbf16, #tpu.memory_space<vmem>>, %arg3: memref<1x512xf32, #tpu.memory_space<vmem>>, %arg4: memref<512x256xbf16, #tpu.memory_space<vmem>>, %arg5: memref<1x256xf32, #tpu.memory_space<vmem>>, %arg6: memref<256x128xbf16, #tpu.memory_space<vmem>>, %arg7: memref<1x128xf32, #tpu.memory_space<vmem>>, %arg8: memref<128x64xbf16, #tpu.memory_space<vmem>>, %arg9: memref<1x64xf32, #tpu.memory_space<vmem>>, %arg10: memref<64x8xbf16, #tpu.memory_space<vmem>>, %arg11: memref<1x8xf32, #tpu.memory_space<vmem>>, %arg12: memref<1x8xf32, #tpu.memory_space<vmem>>, %arg13: memref<1x8xf32, #tpu.memory_space<vmem>>, %arg14: memref<2x8xf32, #tpu.memory_space<vmem>>) attributes {dimension_semantics = [#tpu.dimension_semantics<parallel>], iteration_bounds = array<i64: 1>, scalar_prefetch = 0 : i64, scratch_operands = 0 : i64, tpu.core_type = #tpu.core_type<tc>, window_params = [{transform_indices = @transform_0, window_bounds = array<i64: 2, 32>}, {pipeline_mode = #tpu.pipeline_mode<synchronous>, transform_indices = @transform_1, window_bounds = array<i64: 32, 512>}, {pipeline_mode = #tpu.pipeline_mode<synchronous>, transform_indices = @transform_2, window_bounds = array<i64: 1, 512>}, {pipeline_mode = #tpu.pipeline_mode<synchronous>, transform_indices = @transform_3, window_bounds = array<i64: 512, 256>}, {pipeline_mode = #tpu.pipeline_mode<synchronous>, transform_indices = @transform_4, window_bounds = array<i64: 1, 256>}, {pipeline_mode = #tpu.pipeline_mode<synchronous>, transform_indices = @transform_5, window_bounds = array<i64: 256, 128>}, {pipeline_mode = #tpu.pipeline_mode<synchronous>, transform_indices = @transform_6, window_bounds = array<i64: 1, 128>}, {pipeline_mode = #tpu.pipeline_mode<synchronous>, transform_indices = @transform_7, window_bounds = array<i64: 128, 64>}, {pipeline_mode = #tpu.pipeline_mode<synchronous>, transform_indices = @transform_8, window_bounds = array<i64: 1, 64>}, {pipeline_mode = #tpu.pipeline_mode<synchronous>, transform_indices = @transform_9, window_bounds = array<i64: 64, 8>}, {pipeline_mode = #tpu.pipeline_mode<synchronous>, transform_indices = @transform_10, window_bounds = array<i64: 1, 8>}, {pipeline_mode = #tpu.pipeline_mode<synchronous>, transform_indices = @transform_11, window_bounds = array<i64: 1, 8>}, {pipeline_mode = #tpu.pipeline_mode<synchronous>, transform_indices = @transform_12, window_bounds = array<i64: 1, 8>}, {transform_indices = @transform_13, window_bounds = array<i64: 2, 8>}]} {
    %c0 = arith.constant 0 : index
    %c0_0 = arith.constant 0 : index
    %0 = vector.load %arg1[%c0, %c0_0] : memref<2x32xf32, #tpu.memory_space<vmem>>, vector<2x32xf32>
    %1 = arith.truncf %0 : vector<2x32xf32> to vector<2x32xbf16>
    %c0_1 = arith.constant 0 : index
    %c0_2 = arith.constant 0 : index
    %2 = vector.load %arg2[%c0_1, %c0_2] : memref<32x512xbf16, #tpu.memory_space<vmem>>, vector<32x512xbf16>
    %cst = arith.constant dense<0.000000e+00> : vector<2x512xf32>
    %3 = tpu.matmul %1, %2, %cst {dimension_numbers = #tpu.dot_dimension_numbers<[1], [0], [0], [1], [0, 0, 1, 1], [], []>} : vector<2x32xbf16>, vector<32x512xbf16>, vector<2x512xf32> -> vector<2x512xf32>
    %c0_3 = arith.constant 0 : index
    %c0_4 = arith.constant 0 : index
    %4 = vector.load %arg3[%c0_3, %c0_4] : memref<1x512xf32, #tpu.memory_space<vmem>>, vector<1x512xf32>
    %5 = vector.broadcast %4 : vector<1x512xf32> to vector<2x512xf32>
    %6 = arith.addf %3, %5 : vector<2x512xf32>
    %cst_5 = arith.constant 0.00999999977 : f32
    %7 = vector.broadcast %cst_5 : f32 to vector<2x512xf32>
    %8 = arith.mulf %7, %6 : vector<2x512xf32>
    %9 = arith.maximumf %6, %8 : vector<2x512xf32>
    %10 = arith.truncf %9 : vector<2x512xf32> to vector<2x512xbf16>
    %c0_6 = arith.constant 0 : index
    %c0_7 = arith.constant 0 : index
    %11 = vector.load %arg4[%c0_6, %c0_7] : memref<512x256xbf16, #tpu.memory_space<vmem>>, vector<512x256xbf16>
    %cst_8 = arith.constant dense<0.000000e+00> : vector<2x256xf32>
    %12 = tpu.matmul %10, %11, %cst_8 {dimension_numbers = #tpu.dot_dimension_numbers<[1], [0], [0], [1], [0, 0, 1, 1], [], []>} : vector<2x512xbf16>, vector<512x256xbf16>, vector<2x256xf32> -> vector<2x256xf32>
    %c0_9 = arith.constant 0 : index
    %c0_10 = arith.constant 0 : index
    %13 = vector.load %arg5[%c0_9, %c0_10] : memref<1x256xf32, #tpu.memory_space<vmem>>, vector<1x256xf32>
    %14 = vector.broadcast %13 : vector<1x256xf32> to vector<2x256xf32>
    %15 = arith.addf %12, %14 : vector<2x256xf32>
    %cst_11 = arith.constant 0.00999999977 : f32
    %16 = vector.broadcast %cst_11 : f32 to vector<2x256xf32>
    %17 = arith.mulf %16, %15 : vector<2x256xf32>
    %18 = arith.maximumf %15, %17 : vector<2x256xf32>
    %19 = arith.truncf %18 : vector<2x256xf32> to vector<2x256xbf16>
    %c0_12 = arith.constant 0 : index
    %c0_13 = arith.constant 0 : index
    %20 = vector.load %arg6[%c0_12, %c0_13] : memref<256x128xbf16, #tpu.memory_space<vmem>>, vector<256x128xbf16>
    %cst_14 = arith.constant dense<0.000000e+00> : vector<2x128xf32>
    %21 = tpu.matmul %19, %20, %cst_14 {dimension_numbers = #tpu.dot_dimension_numbers<[1], [0], [0], [1], [0, 0, 1, 1], [], []>} : vector<2x256xbf16>, vector<256x128xbf16>, vector<2x128xf32> -> vector<2x128xf32>
    %c0_15 = arith.constant 0 : index
    %c0_16 = arith.constant 0 : index
    %22 = vector.load %arg7[%c0_15, %c0_16] : memref<1x128xf32, #tpu.memory_space<vmem>>, vector<1x128xf32>
    %23 = vector.broadcast %22 : vector<1x128xf32> to vector<2x128xf32>
    %24 = arith.addf %21, %23 : vector<2x128xf32>
    %cst_17 = arith.constant 0.00999999977 : f32
    %25 = vector.broadcast %cst_17 : f32 to vector<2x128xf32>
    %26 = arith.mulf %25, %24 : vector<2x128xf32>
    %27 = arith.maximumf %24, %26 : vector<2x128xf32>
    %28 = arith.truncf %27 : vector<2x128xf32> to vector<2x128xbf16>
    %c0_18 = arith.constant 0 : index
    %c0_19 = arith.constant 0 : index
    %29 = vector.load %arg8[%c0_18, %c0_19] : memref<128x64xbf16, #tpu.memory_space<vmem>>, vector<128x64xbf16>
    %cst_20 = arith.constant dense<0.000000e+00> : vector<2x64xf32>
    %30 = tpu.matmul %28, %29, %cst_20 {dimension_numbers = #tpu.dot_dimension_numbers<[1], [0], [0], [1], [0, 0, 1, 1], [], []>} : vector<2x128xbf16>, vector<128x64xbf16>, vector<2x64xf32> -> vector<2x64xf32>
    %c0_21 = arith.constant 0 : index
    %c0_22 = arith.constant 0 : index
    %31 = vector.load %arg9[%c0_21, %c0_22] : memref<1x64xf32, #tpu.memory_space<vmem>>, vector<1x64xf32>
    %32 = vector.broadcast %31 : vector<1x64xf32> to vector<2x64xf32>
    %33 = arith.addf %30, %32 : vector<2x64xf32>
    %cst_23 = arith.constant 0.00999999977 : f32
    %34 = vector.broadcast %cst_23 : f32 to vector<2x64xf32>
    %35 = arith.mulf %34, %33 : vector<2x64xf32>
    %36 = arith.maximumf %33, %35 : vector<2x64xf32>
    %37 = arith.truncf %36 : vector<2x64xf32> to vector<2x64xbf16>
    %c0_24 = arith.constant 0 : index
    %c0_25 = arith.constant 0 : index
    %38 = vector.load %arg10[%c0_24, %c0_25] : memref<64x8xbf16, #tpu.memory_space<vmem>>, vector<64x8xbf16>
    %cst_26 = arith.constant dense<0.000000e+00> : vector<2x8xf32>
    %39 = tpu.matmul %37, %38, %cst_26 {dimension_numbers = #tpu.dot_dimension_numbers<[1], [0], [0], [1], [0, 0, 1, 1], [], []>} : vector<2x64xbf16>, vector<64x8xbf16>, vector<2x8xf32> -> vector<2x8xf32>
    %c0_27 = arith.constant 0 : index
    %c0_28 = arith.constant 0 : index
    %40 = vector.load %arg11[%c0_27, %c0_28] : memref<1x8xf32, #tpu.memory_space<vmem>>, vector<1x8xf32>
    %41 = vector.broadcast %40 : vector<1x8xf32> to vector<2x8xf32>
    %42 = arith.addf %39, %41 : vector<2x8xf32>
    %43 = math.tanh %42 : vector<2x8xf32>
    %c0_29 = arith.constant 0 : index
    %c0_30 = arith.constant 0 : index
    %44 = vector.load %arg12[%c0_29, %c0_30] : memref<1x8xf32, #tpu.memory_space<vmem>>, vector<1x8xf32>
    %45 = vector.broadcast %44 : vector<1x8xf32> to vector<2x8xf32>
    %46 = arith.mulf %43, %45 : vector<2x8xf32>
    %c0_31 = arith.constant 0 : index
    %c0_32 = arith.constant 0 : index
    %47 = vector.load %arg13[%c0_31, %c0_32] : memref<1x8xf32, #tpu.memory_space<vmem>>, vector<1x8xf32>
    %48 = vector.broadcast %47 : vector<1x8xf32> to vector<2x8xf32>
    %49 = arith.addf %46, %48 : vector<2x8xf32>
    %c0_33 = arith.constant 0 : index
    %c0_34 = arith.constant 0 : index
    %50 = vector.load %arg14[%c0_33, %c0_34] : memref<2x8xf32, #tpu.memory_space<vmem>>, vector<2x8xf32>
    tpu.vector_store %arg14[%c0_33, %c0_34], %49 {strides = array<i32>} : memref<2x8xf32, #tpu.memory_space<vmem>>, vector<2x8xf32>,
    return
  }
  func.func @transform_0(%arg0: i32) -> (i32, i32) {
    %c0_i32 = arith.constant 0 : i32
    %c0_i32_0 = arith.constant 0 : i32
    return %arg0, %c0_i32 : i32, i32
  }
  func.func @transform_1(%arg0: i32) -> (i32, i32) {
    %c0_i32 = arith.constant 0 : i32
    %c0_i32_0 = arith.constant 0 : i32
    %c0_i32_1 = arith.constant 0 : i32
    return %c0_i32, %c0_i32_0 : i32, i32
  }
  func.func @transform_2(%arg0: i32) -> (i32, i32) {
    %c0_i32 = arith.constant 0 : i32
    %c0_i32_0 = arith.constant 0 : i32
    %c0_i32_1 = arith.constant 0 : i32
    return %c0_i32, %c0_i32_0 : i32, i32
  }
  func.func @transform_3(%arg0: i32) -> (i32, i32) {
    %c0_i32 = arith.constant 0 : i32
    %c0_i32_0 = arith.constant 0 : i32
    %c0_i32_1 = arith.constant 0 : i32
    return %c0_i32, %c0_i32_0 : i32, i32
  }
  func.func @transform_4(%arg0: i32) -> (i32, i32) {
    %c0_i32 = arith.constant 0 : i32
    %c0_i32_0 = arith.constant 0 : i32
    %c0_i32_1 = arith.constant 0 : i32
    return %c0_i32, %c0_i32_0 : i32, i32
  }
  func.func @transform_5(%arg0: i32) -> (i32, i32) {
    %c0_i32 = arith.constant 0 : i32
    %c0_i32_0 = arith.constant 0 : i32
    %c0_i32_1 = arith.constant 0 : i32
    return %c0_i32, %c0_i32_0 : i32, i32
  }
  func.func @transform_6(%arg0: i32) -> (i32, i32) {
    %c0_i32 = arith.constant 0 : i32
    %c0_i32_0 = arith.constant 0 : i32
    %c0_i32_1 = arith.constant 0 : i32
    return %c0_i32, %c0_i32_0 : i32, i32
  }
  func.func @transform_7(%arg0: i32) -> (i32, i32) {
    %c0_i32 = arith.constant 0 : i32
    %c0_i32_0 = arith.constant 0 : i32
    %c0_i32_1 = arith.constant 0 : i32
    return %c0_i32, %c0_i32_0 : i32, i32
  }
  func.func @transform_8(%arg0: i32) -> (i32, i32) {
    %c0_i32 = arith.constant 0 : i32
    %c0_i32_0 = arith.constant 0 : i32
    %c0_i32_1 = arith.constant 0 : i32
    return %c0_i32, %c0_i32_0 : i32, i32
  }
  func.func @transform_9(%arg0: i32) -> (i32, i32) {
    %c0_i32 = arith.constant 0 : i32
    %c0_i32_0 = arith.constant 0 : i32
    %c0_i32_1 = arith.constant 0 : i32
    return %c0_i32, %c0_i32_0 : i32, i32
  }
  func.func @transform_10(%arg0: i32) -> (i32, i32) {
    %c0_i32 = arith.constant 0 : i32
    %c0_i32_0 = arith.constant 0 : i32
    %c0_i32_1 = arith.constant 0 : i32
    return %c0_i32, %c0_i32_0 : i32, i32
  }
  func.func @transform_11(%arg0: i32) -> (i32, i32) {
    %c0_i32 = arith.constant 0 : i32
    %c0_i32_0 = arith.constant 0 : i32
    %c0_i32_1 = arith.constant 0 : i32
    return %c0_i32, %c0_i32_0 : i32, i32
  }
  func.func @transform_12(%arg0: i32) -> (i32, i32) {
    %c0_i32 = arith.constant 0 : i32
    %c0_i32_0 = arith.constant 0 : i32
    %c0_i32_1 = arith.constant 0 : i32
    return %c0_i32, %c0_i32_0 : i32, i32
  }
  func.func @transform_13(%arg0: i32) -> (i32, i32) {
    %c0_i32 = arith.constant 0 : i32
    %c0_i32_0 = arith.constant 0 : i32
    return %arg0, %c0_i32 : i32, i32
  }
}

</mosaic_0001>

<bundles_post_ra>
// kernel: tpu_custom_call.1
= control target key start
LH: loop header
LB: loop body
LE: loop exit
PB: predicated region body
PF: predicated region fallthrough
CT: control target
= control target key end

     0   :  { %18 = vsyncpa [#allocation3], 0  ;;  %s1805_s0 = inlined_call_operand.vmem [shape: f32[2,32], index: 0, kind: input, shape index: {}]   ;;  %s1806_s1 = inlined_call_operand.hbm [shape: bf16[32,512], index: 1, kind: input, shape index: {}]   ;;  %s1807_s2 = inlined_call_operand.vmem [shape: f32[1,512], index: 2, kind: input, shape index: {}]   ;;  %s1808_s3 = inlined_call_operand.hbm [shape: bf16[512,256], index: 3, kind: input, shape index: {}]   ;;  %s1809_s4 = inlined_call_operand.vmem [shape: f32[1,256], index: 4, kind: input, shape index: {}]   ;;  %s1810_s5 = inlined_call_operand.vmem [shape: bf16[256,128], index: 5, kind: input, shape index: {}]   ;;  %s1811_s6 = inlined_call_operand.vmem [shape: f32[1,128], index: 6, kind: input, shape index: {}]   ;;  %s1812_s7 = inlined_call_operand.vmem [shape: bf16[128,64], index: 7, kind: input, shape index: {}]   ;;  %s1813_s8 = inlined_call_operand.vmem [shape: f32[1,64], index: 8, kind: input, shape index: {}]   ;;  %s1814_s9 = inlined_call_operand.vmem [shape: bf16[64,8], index: 9, kind: input, shape index: {}]   ;;  %s1815_s10 = inlined_call_operand.vmem [shape: f32[1,8], index: 10, kind: input, shape index: {}]   ;;  %s1816_s11 = inlined_call_operand.vmem [shape: f32[1,8], index: 11, kind: input, shape index: {}]   ;;  %s1817_s12 = inlined_call_operand.vmem [shape: f32[1,8], index: 12, kind: input, shape index: {}]   ;;  %s1818_s13 = inlined_call_operand.hbm [shape: f32[2,8], index: 13, kind: output, shape index: {}]  }
   0x1   :  { %19 = vsyncpa [#allocation6], 0 }
   0x2   :  { %20 = vsyncpa [#allocation4], 0  ;;  %s1540_s25 = smov [#allocation2]   ;;  %s1468_s29 = scalar_lea.hbm %s1806_s1, 1024 }
   0x3   :  { %s28_s26 = sshll.u32 %s1540_s25, 4  ;;  %p1469_p0 = scmp.ne.s32.totalorder %s1806_s1, %s1468_s29  ;;  %s29_s26 = int_to_ptr.vmem [resolvable:$true] %s28_s26 }
   0x4   :  { %p1472_p1 = scmp.lt.u32.totalorder %s1468_s29, %s1806_s1 }
   0x6   :  { %p1474_p2 = pnand %p1472_p1, %p1469_p0 }
   0x8   :  { %1477 = shalt.err (!%p1474_p2)
}
   0x9   :  { %s1478_s17 = scalar_lea.vmem %s29_s26, 1024  ;;  %p1483_p4 = scmp.lt.s32.totalorder %s29_s26, %s29_s26 }
   0xa   :  { %p1479_p3 = scmp.ne.s32.totalorder %s29_s26, %s1478_s17  ;;  %p1484_p5 = scmp.lt.s32.totalorder %s1478_s17, %s1478_s17 }
   0xc   :  { %p1485_p6 = por %p1484_p5, %p1483_p4 }
   0xe   :  { %p1486_p7 = pnand %p1485_p6, %p1479_p3 }
  0x10   :  { %1489 = shalt.err (!%p1486_p7)
}
  0x11   :  { %s1541_s18 = smov 256   ;;  %s1542_s19 = smov 16  }
  0x12   :  { %34 = dma.hbm_to_vmem [thread:$0]  %s1806_s1, 1024, %s29_s26, [#allocation3], %s1541_s18, %s1541_s18, %s1542_s19  }
  0x13   :  { %s1543_s22 = smov [#allocation5]   ;;  %s1490_s27 = scalar_lea.hbm %s1808_s3, 8192 }
  0x14   :  { %s42_s23 = sshll.u32 %s1543_s22, 4  ;;  %p1491_p8 = scmp.ne.s32.totalorder %s1808_s3, %s1490_s27  ;;  %s43_s23 = int_to_ptr.vmem [resolvable:$true] %s42_s23 }
  0x15   :  { %p1494_p9 = scmp.lt.u32.totalorder %s1490_s27, %s1808_s3 }
  0x17   :  { %p1496_p10 = pnand %p1494_p9, %p1491_p8 }
  0x19   :  { %1499 = shalt.err (!%p1496_p10)
}
  0x1a   :  { %s1500_s15 = scalar_lea.vmem %s43_s23, 8192  ;;  %p1505_p12 = scmp.lt.s32.totalorder %s43_s23, %s43_s23 }
  0x1b   :  { %p1501_p11 = scmp.ne.s32.totalorder %s43_s23, %s1500_s15  ;;  %p1506_p13 = scmp.lt.s32.totalorder %s1500_s15, %s1500_s15 }
  0x1d   :  { %p1507_p0 = por %p1506_p13, %p1505_p12 }
  0x1f   :  { %p1508_p1 = pnand %p1507_p0, %p1501_p11 }
  0x21   :  { %1511 = shalt.err (!%p1508_p1)
}
  0x22   :  { %s1544_s1 = smov 128   ;;  %s1545_s26 = smov 8  }
  0x23   :  { %48 = dma.hbm_to_vmem [thread:$0]  %s1808_s3, 8192, %s43_s23, [#allocation6], %s1544_s1, %s1544_s1, %s1545_s26  }
  0x24   :  { %1534 = dma.done.wait [#allocation3], 1024  }
  0x25   :  { %1535 = vsyncadd [#allocation3], 4294966272 }
  0x26   :  { %1536 = dma.done.wait [#allocation6], 8192  }
  0x27   :  { %1537 = vsyncadd [#allocation6], 4294959104  ;;  %v1546_v0 = vmov 0   ;;  %v1330_v1 = vld [vmem:[#allocation2 + $0x4] ss:$16 sps:$4 sm:$0xff]   ;;  %vm146_vm0 = vcmask 261120   ;;  %v86_v55 = vlaneseq }
  0x28   :  { %182 = vmatprep.mubr.bf16.mxu1 %v1546_v0  ;;  %v1332_v2 = vld [vmem:[#allocation2] ss:$16 sps:$4 sm:$0xff]   ;;  %150 = vmatprep.subr.bf16.mxu1 %v1330_v1  ;;  %v1333_v3 = vld [vmem:[#allocation2 + $0x24] ss:$16 sps:$4 sm:$0xff]   ;;  %v1338_v6 = vld [vmem:[#allocation2 + $0xc] ss:$16 sps:$4 sm:$0xff]  }
  0x29   :  { %v1335_v4 = vld [vmem:[#allocation2 + $0x20] ss:$16 sps:$4 sm:$0xff]   ;;  %151 = vmatpush1.bf16.msra.mxu1 %v1332_v2  ;;  %v1336_v7 = vld [vmem:[#allocation2 + $0x8] ss:$16 sps:$4 sm:$0xff]   ;;  %v1342_v9 = vld [vmem:[#allocation5 + $0x4] ss:$8 sps:$4 sm:$0xff]  }
  0x2a   :  { %v74_v5 = vld [vmem:[%s1805_s0] sm:$0x3]  ;;  %152 = vmatprep.subr.bf16.mxu1 %v1333_v3  ;;  %v1345_v11 = vld [vmem:[#allocation5 + $0x14] ss:$8 sps:$4 sm:$0xff]   ;;  %640 = vmatprep.subr.bf16.mxu0 %v1342_v9  ;;  %v1347_v13 = vld [vmem:[#allocation5 + $0x10] ss:$8 sps:$4 sm:$0xff]  }
  0x2b   :  { %v75_v8 = vpack.c.bf16 %v74_v5, %v74_v5  ;;  %v1344_v10 = vld [vmem:[#allocation5] ss:$8 sps:$4 sm:$0xff]   ;;  %v1341_v12 = vld [vmem:[#allocation2 + $0x2c] ss:$16 sps:$4 sm:$0xff]   ;;  %v1353_v18 = vld [vmem:[#allocation5 + $0x30] ss:$8 sps:$4 sm:$0xff]  }
  0x2c   :  { %641 = vmatpush1.bf16.msra.mxu0 %v1344_v10  ;;  %v1348_v14 = vld [vmem:[#allocation5 + $0x24] ss:$8 sps:$4 sm:$0xff]   ;;  %v1339_v15 = vld [vmem:[#allocation2 + $0x28] ss:$16 sps:$4 sm:$0xff]   ;;  %v1351_v17 = vld [vmem:[#allocation5 + $0x34] ss:$8 sps:$4 sm:$0xff]  }
  0x2d   :  { %153 = vmatpush1.bf16.msra.mxu1 %v1335_v4  ;;  %642 = vmatprep.subr.bf16.mxu0 %v1345_v11  ;;  %v1350_v16 = vld [vmem:[#allocation5 + $0x20] ss:$8 sps:$4 sm:$0xff]   ;;  %v1354_v19 = vld [vmem:[#allocation5 + $0x44] ss:$8 sps:$4 sm:$0xff]   ;;  %v1357_v21 = vld [vmem:[#allocation5 + $0x54] ss:$8 sps:$4 sm:$0xff]  }
  0x2e   :  { %191 = vmatprep.subr.bf16.mxu1 %v1338_v6  ;;  %v1356_v20 = vld [vmem:[#allocation5 + $0x40] ss:$8 sps:$4 sm:$0xff]   ;;  %v1359_v22 = vld [vmem:[#allocation5 + $0x50] ss:$8 sps:$4 sm:$0xff]   ;;  %v1360_v23 = vld [vmem:[#allocation5 + $0x64] ss:$8 sps:$4 sm:$0xff]  }
  0x2f   :  { %v1362_v24 = vld [vmem:[#allocation5 + $0x60] ss:$8 sps:$4 sm:$0xff]   ;;  %v1363_v25 = vld [vmem:[#allocation5 + $0x74] ss:$8 sps:$4 sm:$0xff]   ;;  %v1365_v26 = vld [vmem:[#allocation5 + $0x70] ss:$8 sps:$4 sm:$0xff]  }
  0x30   :  { %1146 = vmatmul.mubr.msk.bf16.vlgmr.msra.gmra.mrb[0].mxu1 %vm146_vm0, %v75_v8  ;;  %643 = vmatpush1.bf16.msra.mxu0 %v1347_v13  ;;  %v1366_v27 = vld [vmem:[#allocation5 + $0x84] ss:$8 sps:$4 sm:$0xff]   ;;  %v1368_v28 = vld [vmem:[#allocation5 + $0x80] ss:$8 sps:$4 sm:$0xff]   ;;  %v1369_v29 = vld [vmem:[#allocation5 + $0x94] ss:$8 sps:$4 sm:$0xff]  }
  0x31   :  { %192 = vmatpush1.bf16.msra.mxu1 %v1336_v7  ;;  %223 = vmatprep.mubr.bf16.mxu1 %v1546_v0  ;;  %v1371_v30 = vld [vmem:[#allocation5 + $0x90] ss:$8 sps:$4 sm:$0xff]   ;;  %v1372_v31 = vld [vmem:[#allocation5 + $0xa4] ss:$8 sps:$4 sm:$0xff]   ;;  %v1374_v32 = vld [vmem:[#allocation5 + $0xa0] ss:$8 sps:$4 sm:$0xff]  }
  0x32   :  { %193 = vmatprep.subr.bf16.mxu1 %v1341_v12  ;;  %644 = vmatprep.subr.bf16.mxu0 %v1348_v14  ;;  %v1375_v33 = vld [vmem:[#allocation5 + $0xb4] ss:$8 sps:$4 sm:$0xff]   ;;  %v1377_v34 = vld [vmem:[#allocation5 + $0xb0] ss:$8 sps:$4 sm:$0xff]   ;;  %v1378_v35 = vld [vmem:[#allocation5 + $0xc4] ss:$8 sps:$4 sm:$0xff]  }
  0x33   :  { %v1380_v36 = vld [vmem:[#allocation5 + $0xc0] ss:$8 sps:$4 sm:$0xff]   ;;  %v1381_v37 = vld [vmem:[#allocation5 + $0xd4] ss:$8 sps:$4 sm:$0xff]   ;;  %v1383_v38 = vld [vmem:[#allocation5 + $0xd0] ss:$8 sps:$4 sm:$0xff]  }
  0x34   :  { %645 = vmatpush1.bf16.msra.mxu0 %v1350_v16  ;;  %v1384_v39 = vld [vmem:[#allocation5 + $0xe4] ss:$8 sps:$4 sm:$0xff]   ;;  %v1386_v40 = vld [vmem:[#allocation5 + $0xe0] ss:$8 sps:$4 sm:$0xff]   ;;  %v1387_v41 = vld [vmem:[#allocation5 + $0xf4] ss:$8 sps:$4 sm:$0xff]  }
  0x35   :  { %194 = vmatpush1.bf16.msra.mxu1 %v1339_v15  ;;  %646 = vmatprep.subr.bf16.mxu0 %v1351_v17  ;;  %v1389_v42 = vld [vmem:[#allocation5 + $0xf0] ss:$8 sps:$4 sm:$0xff]   ;;  %v1392_v43 = vld [vmem:[#allocation5 + $0x104] ss:$8 sps:$4 sm:$0xff]   ;;  %v1682_v56 = vshrl.u32 %v86_v55, 7  ;;  %vm1548_vm1 = vmmov 0  }
  0x36   :  { %v1438_v44 = vld [vmem:[%s1810_s5 + $0x40] sm:$0xff]   ;;  %v1440_v46 = vld [vmem:[%s1810_s5 + $0x48] sm:$0xff]   ;;  %v1442_v48 = vld [vmem:[%s1810_s5 + $0x50] sm:$0xff]   ;;  %vm1059_vm2 = vcmask 523264   ;;  %s1549_s0 = smov [#allocation7]   ;;  %vm1120_vm3 = vcmask 58368  }
  0x37   :  { %v1439_v45 = vld [vmem:[%s1810_s5] sm:$0xff]   ;;  %1246 = vmatprep.subr.bf16.mxu1 %v1438_v44  ;;  %v1441_v47 = vld [vmem:[%s1810_s5 + $0x8] sm:$0xff]   ;;  %v1443_v49 = vld [vmem:[%s1810_s5 + $0x10] sm:$0xff]   ;;  %v88_v57 = vsub.s32 0, %v1682_v56  ;;  %v92_v59 = vsub.s32 1, %v1682_v56  ;;  %v100_v3 = vsub.s32 3, %v1682_v56 }
  0x38   :  { %1147 = vmatmul.mubr.msk.bf16.vlgmr.msra.gmra.mrb[4].mxu1 %vm146_vm0, %v75_v8  ;;  %647 = vmatpush1.bf16.msra.mxu0 %v1353_v18  ;;  %v1444_v50 = vld [vmem:[%s1810_s5 + $0x58] sm:$0xff]   ;;  %v1446_v52 = vld [vmem:[%s1810_s5 + $0x60] sm:$0xff]   ;;  %v1448_v54 = vld [vmem:[%s1810_s5 + $0x68] sm:$0xff]   ;;  %v96_v44 = vsub.s32 2, %v1682_v56  ;;  %s1128_s3 = sshll.u32 %s1549_s0, 4  ;;  %s1129_s3 = int_to_ptr.vmem [resolvable:$true] %s1128_s3 }
  0x39   :  { %648 = vmatprep.subr.bf16.mxu0 %v1354_v19  ;;  %1247 = vmatpush3.bf16.msra.mxu1 %v1439_v45  ;;  %v1445_v51 = vld [vmem:[%s1810_s5 + $0x18] sm:$0xff]   ;;  %v1447_v53 = vld [vmem:[%s1810_s5 + $0x20] sm:$0xff]   ;;  %v1455_v56 = vld [vmem:[%s1812_s7 + $0x8] sm:$0xff]   ;;  %p1517_p3 = scmp.lt.s32.totalorder %s1129_s3, %s1129_s3 }
  0x3a   :  { %1248 = vmatprep.subr.bf16.mxu1 %v1440_v46  ;;  %v1688_v58 = vld [vmem:[%s1807_s2] sm:$0xf]  ;;  %v1395_v14 = vld [vmem:[#allocation5 + $0x114] ss:$8 sps:$4 sm:$0xff]   ;;  %v1393_v19 = vld [vmem:[#allocation5 + $0x110] ss:$8 sps:$4 sm:$0xff]  }
  0x3b   :  { %v89_v60 = vrot.slane %v1688_v58, %v88_v57  ;;  %v93_v61 = vrot.slane %v1688_v58, %v92_v59  ;;  %v101_v9 = vrot.slane %v1688_v58, %v100_v3  ;;  %v1390_v11 = vld [vmem:[#allocation5 + $0x100] ss:$8 sps:$4 sm:$0xff]   ;;  %v97_v46 = vrot.slane %v1688_v58, %v96_v44 }
  0x3c   :  { %649 = vmatpush1.bf16.msra.mxu0 %v1356_v20  ;;  %v1426_v45 = vld [vmem:[#allocation5 + $0x1c0] ss:$8 sps:$4 sm:$0xff]  }
  0x3d   :  { %650 = vmatprep.subr.bf16.mxu0 %v1357_v21  ;;  %1249 = vmatpush3.bf16.msra.mxu1 %v1441_v47  ;;  %v1398_v21 = vld [vmem:[#allocation5 + $0x124] ss:$8 sps:$4 sm:$0xff]   ;;  %v1431_v47 = vld [vmem:[#allocation5 + $0x1d4] ss:$8 sps:$4 sm:$0xff]  }
  0x3e   :  { %1250 = vmatprep.subr.bf16.mxu1 %v1442_v48  ;;  %v1429_v48 = vld [vmem:[#allocation5 + $0x1d0] ss:$8 sps:$4 sm:$0xff]   ;;  %v1449_v58 = vld [vmem:[%s1810_s5 + $0x28] sm:$0xff]  }
  0x40   :  { %651 = vmatpush1.bf16.msra.mxu0 %v1359_v22 }
  0x41   :  { %652 = vmatprep.subr.bf16.mxu0 %v1360_v23  ;;  %1251 = vmatpush3.bf16.msra.mxu1 %v1443_v49  ;;  %v1396_v23 = vld [vmem:[#allocation5 + $0x120] ss:$8 sps:$4 sm:$0xff]  }
  0x42   :  { %1252 = vmatprep.subr.bf16.mxu1 %v1444_v50  ;;  %v1434_v50 = vld [vmem:[#allocation5 + $0x1e4] ss:$8 sps:$4 sm:$0xff]  }
  0x44   :  { %653 = vmatpush1.bf16.msra.mxu0 %v1362_v24 }
  0x45   :  { %654 = vmatprep.subr.bf16.mxu0 %v1363_v25  ;;  %1253 = vmatpush3.bf16.msra.mxu1 %v1445_v51  ;;  %v1401_v25 = vld [vmem:[#allocation5 + $0x134] ss:$8 sps:$4 sm:$0xff]   ;;  %v1432_v51 = vld [vmem:[#allocation5 + $0x1e0] ss:$8 sps:$4 sm:$0xff]  }
  0x46   :  { %1254 = vmatprep.subr.bf16.mxu1 %v1446_v52 }
  0x48   :  { %655 = vmatpush1.bf16.msra.mxu0 %v1365_v26  ;;  %v1399_v26 = vld [vmem:[#allocation5 + $0x130] ss:$8 sps:$4 sm:$0xff]  }
  0x49   :  { %656 = vmatprep.subr.bf16.mxu0 %v1366_v27  ;;  %1255 = vmatpush3.bf16.msra.mxu1 %v1447_v53  ;;  %v1404_v27 = vld [vmem:[#allocation5 + $0x144] ss:$8 sps:$4 sm:$0xff]   ;;  %v1437_v53 = vld [vmem:[#allocation5 + $0x1f4] ss:$8 sps:$4 sm:$0xff]  }
  0x4a   :  { %1256 = vmatprep.subr.bf16.mxu1 %v1448_v54  ;;  %v1435_v54 = vld [vmem:[#allocation5 + $0x1f0] ss:$8 sps:$4 sm:$0xff]  }
  0x4c   :  { %657 = vmatpush1.bf16.msra.mxu0 %v1368_v28  ;;  %v1402_v28 = vld [vmem:[#allocation5 + $0x140] ss:$8 sps:$4 sm:$0xff]  }
  0x4d   :  { %658 = vmatprep.subr.bf16.mxu0 %v1369_v29  ;;  %v1407_v29 = vld [vmem:[#allocation5 + $0x154] ss:$8 sps:$4 sm:$0xff]   ;;  %1257 = vmatpush3.bf16.msra.mxu1 %v1449_v58 }
  0x50   :  { %659 = vmatpush1.bf16.msra.mxu0 %v1371_v30  ;;  %v1405_v30 = vld [vmem:[#allocation5 + $0x150] ss:$8 sps:$4 sm:$0xff]  }
  0x51   :  { %660 = vmatprep.subr.bf16.mxu0 %v1372_v31  ;;  %v1410_v31 = vld [vmem:[#allocation5 + $0x164] ss:$8 sps:$4 sm:$0xff]  }
  0x54   :  { %661 = vmatpush1.bf16.msra.mxu0 %v1374_v32  ;;  %v1408_v32 = vld [vmem:[#allocation5 + $0x160] ss:$8 sps:$4 sm:$0xff]  }
  0x55   :  { %662 = vmatprep.subr.bf16.mxu0 %v1375_v33  ;;  %v1413_v33 = vld [vmem:[#allocation5 + $0x174] ss:$8 sps:$4 sm:$0xff]  }
  0x58   :  { %663 = vmatpush1.bf16.msra.mxu0 %v1377_v34  ;;  %v1411_v34 = vld [vmem:[#allocation5 + $0x170] ss:$8 sps:$4 sm:$0xff]  }
  0x59   :  { %664 = vmatprep.subr.bf16.mxu0 %v1378_v35  ;;  %v1416_v35 = vld [vmem:[#allocation5 + $0x184] ss:$8 sps:$4 sm:$0xff]  }
  0x5c   :  { %665 = vmatpush1.bf16.msra.mxu0 %v1380_v36  ;;  %v1414_v36 = vld [vmem:[#allocation5 + $0x180] ss:$8 sps:$4 sm:$0xff]  }
  0x5d   :  { %666 = vmatprep.subr.bf16.mxu0 %v1381_v37  ;;  %v1419_v37 = vld [vmem:[#allocation5 + $0x194] ss:$8 sps:$4 sm:$0xff]  }
  0x60   :  { %667 = vmatpush1.bf16.msra.mxu0 %v1383_v38  ;;  %v1417_v38 = vld [vmem:[#allocation5 + $0x190] ss:$8 sps:$4 sm:$0xff]  }
  0x61   :  { %668 = vmatprep.subr.bf16.mxu0 %v1384_v39  ;;  %v1422_v39 = vld [vmem:[#allocation5 + $0x1a4] ss:$8 sps:$4 sm:$0xff]  }
  0x64   :  { %669 = vmatpush1.bf16.msra.mxu0 %v1386_v40  ;;  %v1420_v40 = vld [vmem:[#allocation5 + $0x1a0] ss:$8 sps:$4 sm:$0xff]  }
  0x65   :  { %670 = vmatprep.subr.bf16.mxu0 %v1387_v41  ;;  %v1425_v41 = vld [vmem:[#allocation5 + $0x1b4] ss:$8 sps:$4 sm:$0xff]  }
  0x68   :  { %671 = vmatpush1.bf16.msra.mxu0 %v1389_v42  ;;  %v1423_v42 = vld [vmem:[#allocation5 + $0x1b0] ss:$8 sps:$4 sm:$0xff]  }
  0x69   :  { %681 = vmatprep.subr.bf16.mxu0 %v1392_v43  ;;  %v1428_v43 = vld [vmem:[#allocation5 + $0x1c4] ss:$8 sps:$4 sm:$0xff]  }
 0x103   :  { %v184_v62 = vpop.f32.mrb[0].mxu1 }
 0x104   :  { %v185_v63 = vadd.f32 %v184_v62, %v89_v60  ;;  %v186_v0 = vpop.f32.mrb[1].mxu1  ;;  %v1451_v62 = vld [vmem:[%s1810_s5 + $0x30] sm:$0xff]  }
 0x105   :  { %v187_v1 = vadd.f32 %v186_v0, %v93_v61  ;;  %v188_v2 = vpop.f32.mrb[2].mxu1  ;;  %v1450_v61 = vld [vmem:[%s1810_s5 + $0x70] sm:$0xff]   ;;  %v1453_v0 = vld [vmem:[%s1810_s5 + $0x38] sm:$0xff]  }
 0x106   :  { %v232_v4 = vmul.f32 0.01, %v185_v63  ;;  %v189_v5 = vpop.f32.mrb[3].mxu1  ;;  %1258 = vmatprep.subr.bf16.mxu1 %v1450_v61  ;;  %v308_v2 = vld [vmem:[%s1809_s4] sm:$0x3] }
 0x107   :  { %v233_v6 = vmul.f32 0.01, %v187_v1  ;;  %1259 = vmatpush3.bf16.msra.mxu1 %v1451_v62  ;;  %v313_v3 = vrot.slane %v308_v2, %v88_v57  ;;  %v1456_v57 = vld [vmem:[%s1812_s7 + $0x10] sm:$0xff]  }
 0x108   :  { %v236_v7 = vmax.f32 %v185_v63, %v232_v4  ;;  %v1452_v63 = vld [vmem:[%s1810_s5 + $0x78] sm:$0xff]   ;;  %v317_v4 = vrot.slane %v308_v2, %v92_v59 }
 0x109   :  { %v237_v8 = vmax.f32 %v187_v1, %v233_v6  ;;  %1260 = vmatprep.subr.bf16.mxu1 %v1452_v63  ;;  %v1547_v1 = vmov 0.0   ;;  %v1457_v59 = vld [vmem:[%s1812_s7 + $0x18] sm:$0xff]  }
 0x10a   :  { %v240_v13 = vpack.c.bf16 %v236_v7, %v236_v7 }
 0x10b   :  { %v241_v10 = vpack.c.bf16 %v237_v8, %v237_v8  ;;  %v1699_v12 = vpop.f32.mrb[4].mxu1  ;;  %1261 = vmatpush3.bf16.msra.mxu1 %v1453_v0 }
 0x10c   :  { %v227_v15 = vpop.f32.mrb[5].mxu1  ;;  %v226_v49 = vadd.f32 %v1699_v12, %v97_v46  ;;  %1282 = vmatprep.subr.bf16.mxu1 %v1547_v1 }
 0x10d   :  { %672 = vmatprep.mubr.bf16.mxu0 %v241_v10  ;;  %v228_v16 = vadd.f32 %v227_v15, %v101_v9  ;;  %v229_v17 = vpop.f32.mrb[6].mxu1 }
 0x10e   :  { %673 = vmatmul.mubr.bf16.vlgmr.msra.gmra.mrb[0].mxu0 %v240_v13  ;;  %v230_v18 = vpop.f32.mrb[7].mxu1  ;;  %v234_v52 = vmul.f32 0.01, %v226_v49 }
 0x10f   :  { %682 = vmatpush1.bf16.msra.mxu0 %v1390_v11  ;;  %v235_v20 = vmul.f32 0.01, %v228_v16  ;;  %v1458_v18 = vld [vmem:[%s1812_s7 + $0x20] sm:$0xff]  }
 0x110   :  { %683 = vmatprep.subr.bf16.mxu0 %v1395_v14  ;;  %v238_v55 = vmax.f32 %v226_v49, %v234_v52 }
 0x111   :  { %v239_v22 = vmax.f32 %v228_v16, %v235_v20  ;;  %v1454_v16 = vld [vmem:[%s1812_s7] sm:$0xff]   ;;  %v1460_v20 = vld [vmem:[%s1812_s7 + $0x30] sm:$0xff]  }
 0x112   :  { %v242_v60 = vpack.c.bf16 %v238_v55, %v238_v55 }
 0x113   :  { %684 = vmatpush1.bf16.msra.mxu0 %v1393_v19  ;;  %v243_v24 = vpack.c.bf16 %v239_v22, %v239_v22  ;;  %v1459_v19 = vld [vmem:[%s1812_s7 + $0x28] sm:$0xff]  }
 0x114   :  { %685 = vmatprep.subr.bf16.mxu0 %v1398_v21  ;;  %v1461_v21 = vld [vmem:[%s1812_s7 + $0x38] sm:$0xff]  }
 0x115   :  { %713 = vmatprep.mubr.bf16.mxu0 %v243_v24 }
 0x117   :  { %686 = vmatpush1.bf16.msra.mxu0 %v1396_v23  ;;  %v1212_v23 = vld [vmem:[%s1811_s6] ss:$0 sm:$0xff] }
 0x118   :  { %687 = vmatprep.subr.bf16.mxu0 %v1401_v25 }
 0x11b   :  { %688 = vmatpush1.bf16.msra.mxu0 %v1399_v26 }
 0x11c   :  { %689 = vmatprep.subr.bf16.mxu0 %v1404_v27 }
 0x11f   :  { %690 = vmatpush1.bf16.msra.mxu0 %v1402_v28 }
 0x120   :  { %691 = vmatprep.subr.bf16.mxu0 %v1407_v29 }
 0x123   :  { %692 = vmatpush1.bf16.msra.mxu0 %v1405_v30 }
 0x124   :  { %693 = vmatprep.subr.bf16.mxu0 %v1410_v31  ;;  %v1462_v31 = vld [vmem:[%s1814_s9] sm:$0xff]  }
 0x127   :  { %694 = vmatpush1.bf16.msra.mxu0 %v1408_v32 }
 0x128   :  { %695 = vmatprep.subr.bf16.mxu0 %v1413_v33  ;;  %v1463_v33 = vld [vmem:[%s1814_s9 + $0x8] sm:$0xff]  }
 0x12b   :  { %696 = vmatpush1.bf16.msra.mxu0 %v1411_v34  ;;  %v1464_v34 = vld [vmem:[%s1814_s9 + $0x10] sm:$0xff]  }
 0x12c   :  { %697 = vmatprep.subr.bf16.mxu0 %v1416_v35  ;;  %v1465_v35 = vld [vmem:[%s1814_s9 + $0x18] sm:$0xff]  }
 0x12f   :  { %698 = vmatpush1.bf16.msra.mxu0 %v1414_v36  ;;  %v1229_v36 = vld [vmem:[%s1813_s8] ss:$0 sm:$0xff] }
 0x130   :  { %699 = vmatprep.subr.bf16.mxu0 %v1419_v37 }
 0x133   :  { %700 = vmatpush1.bf16.msra.mxu0 %v1417_v38 }
 0x134   :  { %701 = vmatprep.subr.bf16.mxu0 %v1422_v39 }
 0x137   :  { %702 = vmatpush1.bf16.msra.mxu0 %v1420_v40 }
 0x138   :  { %703 = vmatprep.subr.bf16.mxu0 %v1425_v41 }
 0x13b   :  { %704 = vmatpush1.bf16.msra.mxu0 %v1423_v42 }
 0x13c   :  { %705 = vmatprep.subr.bf16.mxu0 %v1428_v43 }
 0x13f   :  { %706 = vmatpush1.bf16.msra.mxu0 %v1426_v45  ;;  %v1238_v45 = vld [vmem:[%s1815_s10] ss:$0 sm:$0xff]  ;;  %s1512_s10 = scalar_lea.vmem %s1129_s3, 32 }
 0x140   :  { %707 = vmatprep.subr.bf16.mxu0 %v1431_v47  ;;  %p1513_p2 = scmp.ne.s32.totalorder %s1129_s3, %s1512_s10  ;;  %p1518_p4 = scmp.lt.s32.totalorder %s1512_s10, %s1512_s10 }
 0x142   :  { %p1519_p5 = por %p1518_p4, %p1517_p3 }
 0x143   :  { %708 = vmatpush1.bf16.msra.mxu0 %v1429_v48 }
 0x144   :  { %709 = vmatprep.subr.bf16.mxu0 %v1434_v50  ;;  %p1520_p6 = pnand %p1519_p5, %p1513_p2 }
 0x147   :  { %710 = vmatpush1.bf16.msra.mxu0 %v1432_v51  ;;  %v1244_v51 = vld [vmem:[%s1816_s11] ss:$0 sm:$0xff] }
 0x148   :  { %711 = vmatprep.subr.bf16.mxu0 %v1437_v53  ;;  %v1245_v53 = vld [vmem:[%s1817_s12] ss:$0 sm:$0xff] }
 0x14b   :  { %712 = vmatpush1.bf16.msra.mxu0 %v1435_v54 }
 0x14e   :  { %714 = vmatmul.mubr.bf16.vlgmr.msra.gmra.mrb[0].mxu0 %v242_v60 }
 0x221   :  { %v715_v5 = vpop.f32.mrb[0].mxu0 }
 0x222   :  { %v1314_v6 = vadd.f32 %v715_v5, %v313_v3  ;;  %v717_v7 = vpop.f32.mrb[1].mxu0 }
 0x223   :  { %v1315_v8 = vadd.f32 %v717_v7, %v317_v4  ;;  %v719_v9 = vpop.f32.mrb[2].mxu0 }
 0x224   :  { %v722_v10 = vmul.f32 0.01, %v1314_v6  ;;  %v720_v11 = vpop.f32.mrb[3].mxu0 }
 0x225   :  { %v723_v12 = vmul.f32 0.01, %v1315_v8 }
 0x226   :  { %v724_v13 = vmax.f32 %v1314_v6, %v722_v10 }
 0x227   :  { %v725_v14 = vmax.f32 %v1315_v8, %v723_v12 }
 0x228   :  { %v726_v17 = vpack.c.bf16 %v724_v13, %v724_v13 }
 0x229   :  { %v727_v15 = vpack.c.bf16 %v725_v14, %v725_v14 }
 0x22b   :  { %895 = vmatprep.mubr.bf16.mxu1 %v727_v15 }
 0x22c   :  { %896 = vmatmul.mubr.bf16.vlgmr.msra.gmra.mrb[8].mxu1 %v726_v17 }
 0x22d   :  { %1283 = vmatpush3.bf16.msra.mxu1 %v1454_v16  ;;  %1298 = vmatprep.mubr.msk.bf16.mxu1 %vm1548_vm1, %v1547_v1 }
 0x22e   :  { %1284 = vmatprep.subr.bf16.mxu1 %v1547_v1 }
 0x231   :  { %1285 = vmatpush3.bf16.msra.mxu1 %v1455_v56 }
 0x232   :  { %1286 = vmatprep.subr.bf16.mxu1 %v1547_v1 }
 0x235   :  { %1287 = vmatpush3.bf16.msra.mxu1 %v1456_v57 }
 0x236   :  { %1288 = vmatprep.subr.bf16.mxu1 %v1547_v1 }
 0x239   :  { %1289 = vmatpush3.bf16.msra.mxu1 %v1457_v59 }
 0x23a   :  { %1290 = vmatprep.subr.bf16.mxu1 %v1547_v1 }
 0x23d   :  { %1291 = vmatpush3.bf16.msra.mxu1 %v1458_v18 }
 0x23e   :  { %1292 = vmatprep.subr.bf16.mxu1 %v1547_v1 }
 0x241   :  { %1293 = vmatpush3.bf16.msra.mxu1 %v1459_v19 }
 0x242   :  { %1294 = vmatprep.subr.bf16.mxu1 %v1547_v1 }
 0x245   :  { %1295 = vmatpush3.bf16.msra.mxu1 %v1460_v20 }
 0x246   :  { %1296 = vmatprep.subr.bf16.mxu1 %v1547_v1 }
 0x249   :  { %1297 = vmatpush3.bf16.msra.mxu1 %v1461_v21 }
 0x24a   :  { %1302 = vmatprep.subr.bf16.mxu1 %v1547_v1 }
 0x2ff   :  { %v1262_v22 = vpop.f32.mrb[8].mxu1 }
 0x300   :  { %v1263_v24 = vpop.f32.mrb[9].mxu1 }
 0x301   :  { %v1264_v25 = vadd.f32 %v1263_v24, %v1262_v22  ;;  %v1265_v26 = vpop.f32.mrb[10].mxu1 }
 0x302   :  { %v1266_v27 = vpop.f32.mrb[11].mxu1 }
 0x303   :  { %v898_v28 = vadd.f32 %v1264_v25, %v1212_v23 }
 0x305   :  { %v903_v29 = vmul.f32 0.01, %v898_v28 }
 0x307   :  { %v904_v30 = vmax.f32 %v898_v28, %v903_v29 }
 0x309   :  { %v905_v32 = vpack.c.bf16 %v904_v30, %v904_v30 }
 0x30b   :  { %1299 = vmatmul.mubr.bf16.vlgmr.msra.gmra.mrb[12].mxu1 %v905_v32 }
 0x30c   :  { %1303 = vmatpush3.bf16.msra.mxu1 %v1462_v31  ;;  %1310 = vmatprep.mubr.msk.bf16.mxu1 %vm1548_vm1, %v1547_v1 }
 0x30d   :  { %1304 = vmatprep.subr.bf16.mxu1 %v1547_v1 }
 0x310   :  { %1305 = vmatpush3.bf16.msra.mxu1 %v1463_v33 }
 0x311   :  { %1306 = vmatprep.subr.bf16.mxu1 %v1547_v1 }
 0x314   :  { %1307 = vmatpush3.bf16.msra.mxu1 %v1464_v34 }
 0x315   :  { %1308 = vmatprep.subr.bf16.mxu1 %v1547_v1 }
 0x318   :  { %1309 = vmatpush3.bf16.msra.mxu1 %v1465_v35 }
 0x3de   :  { %v1011_v37 = vpop.f32.mrb[12].mxu1 }
 0x3df   :  { %v1012_v38 = vadd.f32 %v1229_v36, %v1011_v37  ;;  %v1300_v39 = vpop.f32.mrb[13].mxu1 }
 0x3e0   :  { %v1014_v40 = vpop.f32.mrb[14].mxu1 }
 0x3e1   :  { %v1017_v41 = vmul.f32 0.01, %v1012_v38  ;;  %v1301_v42 = vpop.f32.mrb[15].mxu1 }
 0x3e3   :  { %v1018_v43 = vmax.f32 %v1012_v38, %v1017_v41 }
 0x3e5   :  { %v1019_v44 = vpack.c.bf16 %v1018_v43, %v1018_v43 }
 0x3e7   :  { %1311 = vmatmul.mubr.msk.bf16.vlgmr.msra.gmra.mrb[16].mxu1 %vm1059_vm2, %v1019_v44 }
 0x4ba   :  { %v1097_v46 = vpop.f32.mrb[16].mxu1 }
 0x4bb   :  { %v1098_v47 = vadd.f32 %v1238_v45, %v1097_v46  ;;  %v1312_v48 = vpop.f32.mrb[17].mxu1 }
 0x4bc   :  { %v1100_v49 = vpop.f32.mrb[18].mxu1 }
 0x4bd   :  { %1466 = vtanh.f32 %v1098_v47  ;;  %v1313_v50 = vpop.f32.mrb[19].mxu1 }
 0x4c7   :  { %v1467_v52 = vpop.eup %1466 }
 0x4c8   :  { %v1111_v54 = vmul.f32 %v1467_v52, %v1244_v51 }
 0x4ca   :  { %v1119_v55 = vadd.f32 %v1245_v53, %v1111_v54 }
 0x4cc   :  { %1121 = vst.msk [vmem:[#allocation7] sm:$0x3] %vm1120_vm3, %v1119_v55 }
 0x4cd   :  { %1523 = shalt.err (!%p1520_p6)
}
 0x4ce   :  { %s1524_s21 = scalar_lea.hbm %s1818_s13, 32 }
 0x4cf   :  { %p1525_p7 = scmp.ne.s32.totalorder %s1818_s13, %s1524_s21  ;;  %p1528_p8 = scmp.lt.u32.totalorder %s1524_s21, %s1818_s13 }
 0x4d1   :  { %p1530_p9 = pnand %p1528_p8, %p1525_p7 }
 0x4d3   :  { %1533 = shalt.err (!%p1530_p9)
}
 0x4d4   :  { %1131 = dma.vmem_to_hbm [thread:$0]  %s1129_s3, 32, %s1818_s13, [#allocation4]  }
 0x4d5   :  { %1538 = dma.done.wait [#allocation4], 32  }
 0x4d6   :  { %1539 = vsyncadd [#allocation4], 4294967264 }
 0x4d7   :  { %1135 = vsyncpa [#allocation3], 1 }
 0x4d8   :  { %1136 = vsyncpa [#allocation6], 1 }
 0x4d9   :  { %1137 = vsyncpa [#allocation4], 1 }

</bundles_post_ra>
